<compile_context>
chip_gen: v7x
topology: tpu7x:2x2x1
jax: 0.10.0
libtpu: 0.0.40
codegen_flags: <defaults>
</compile_context>

<pallas_src>
import functools

import jax
import jax.numpy as jnp
from jax.experimental import pallas as pl
from jax.experimental.pallas import tpu as pltpu

_LN_EPS = 1e-5  # nn.LayerNorm default


# ---------------------- fused LayerNorm + Linear kernel ----------------------
def _prenorm_linear_kernel(x_ref, g_ref, b_ref, w_ref, bias_ref, o_ref):
    # x_ref: (tile_rows, D). LayerNorm over lanes (last dim) in f32, then the
    # normalized block feeds straight into an MXU matmul against the resident
    # (D, Dout) weight block. Single HBM read of x, single HBM write of out.
    x = x_ref[...].astype(jnp.float32)
    mean = jnp.mean(x, axis=-1, keepdims=True)
    xc = x - mean
    var = jnp.mean(xc * xc, axis=-1, keepdims=True)
    inv = jax.lax.rsqrt(var + _LN_EPS)                 # EUP rsqrt, hidden slot
    y = xc * inv * g_ref[...].astype(jnp.float32) + b_ref[...].astype(jnp.float32)
    acc = jnp.dot(y.astype(w_ref.dtype), w_ref[...],
                  preferred_element_type=jnp.float32)
    o_ref[...] = (acc + bias_ref[...].astype(jnp.float32)).astype(o_ref.dtype)


# --------------------------- standalone LayerNorm ----------------------------
def _layernorm_kernel(x_ref, g_ref, b_ref, o_ref):
    x = x_ref[...].astype(jnp.float32)
    mean = jnp.mean(x, axis=-1, keepdims=True)
    xc = x - mean
    var = jnp.mean(xc * xc, axis=-1, keepdims=True)
    inv = jax.lax.rsqrt(var + _LN_EPS)
    y = xc * inv * g_ref[...].astype(jnp.float32) + b_ref[...].astype(jnp.float32)
    o_ref[...] = y.astype(o_ref.dtype)


def _choose_tile_rows(n_rows, requested):
    """Pick a row-tile: multiple of 8, no bigger than needed, <= requested."""
    tile = max(8, min(requested, pl.cdiv(n_rows, 8) * 8))
    # Keep it a multiple of 8 (sublane) — requested defaults already are.
    return (tile // 8) * 8 if tile % 8 else tile


def _pad_rows(x2d, tile_rows):
    """Pad rows to a multiple of tile_rows (static shapes under jit)."""
    R = x2d.shape[0]
    Rp = pl.cdiv(R, tile_rows) * tile_rows
    if Rp != R:
        x2d = jnp.pad(x2d, ((0, Rp - R), (0, 0)))
    return x2d, Rp


@functools.partial(jax.jit, static_argnames=("tile_rows",))
def prenorm_linear_pallas(x, gamma, beta, w, bias, *, tile_rows=256):
    """Fused fn(LayerNorm(x)) for fn = Linear(D, Dout); x is (..., D)."""
    orig_shape = x.shape
    D = orig_shape[-1]
    Dout = w.shape[1]
    x2d = x.reshape(-1, D)
    R = x2d.shape[0]
    tr = _choose_tile_rows(R, tile_rows)
    x2d, Rp = _pad_rows(x2d, tr)

    out = pl.pallas_call(
        _prenorm_linear_kernel,
        out_shape=jax.ShapeDtypeStruct((Rp, Dout), x.dtype),
        grid_spec=pltpu.PrefetchScalarGridSpec(
            num_scalar_prefetch=0,
            grid=(Rp // tr,),
            in_specs=[
                pl.BlockSpec((tr, D), lambda i: (i, 0)),      # x tile
                pl.BlockSpec((1, D), lambda i: (0, 0)),       # gamma (resident)
                pl.BlockSpec((1, D), lambda i: (0, 0)),       # beta  (resident)
                pl.BlockSpec((D, Dout), lambda i: (0, 0)),    # W     (resident)
                pl.BlockSpec((1, Dout), lambda i: (0, 0)),    # bias  (resident)
            ],
            out_specs=pl.BlockSpec((tr, Dout), lambda i: (i, 0)),
        ),
        compiler_params=pltpu.CompilerParams(
            dimension_semantics=("parallel",)),               # shards rows across v7x TCs
    )(x2d, gamma.reshape(1, D), beta.reshape(1, D), w, bias.reshape(1, Dout))

    return out[:R].reshape(orig_shape[:-1] + (Dout,))


@functools.partial(jax.jit, static_argnames=("tile_rows",))
def layernorm_pallas(x, gamma, beta, *, tile_rows=256):
    """Standalone LayerNorm over the last dim; x is (..., D)."""
    orig_shape = x.shape
    D = orig_shape[-1]
    x2d = x.reshape(-1, D)
    R = x2d.shape[0]
    tr = _choose_tile_rows(R, tile_rows)
    x2d, Rp = _pad_rows(x2d, tr)

    out = pl.pallas_call(
        _layernorm_kernel,
        out_shape=jax.ShapeDtypeStruct((Rp, D), x.dtype),
        grid_spec=pltpu.PrefetchScalarGridSpec(
            num_scalar_prefetch=0,
            grid=(Rp // tr,),
            in_specs=[
                pl.BlockSpec((tr, D), lambda i: (i, 0)),
                pl.BlockSpec((1, D), lambda i: (0, 0)),
                pl.BlockSpec((1, D), lambda i: (0, 0)),
            ],
            out_specs=pl.BlockSpec((tr, D), lambda i: (i, 0)),
        ),
        compiler_params=pltpu.CompilerParams(
            dimension_semantics=("parallel",)),
    )(x2d, gamma.reshape(1, D), beta.reshape(1, D))

    return out[:R].reshape(orig_shape)


# --------------------------------- PreNorm -----------------------------------
class PallasLinear:
    """Deterministic Linear(D -> Dout) used as the wrapped `fn` in the demo."""

    def __init__(self, w, b):
        self.w = w
        self.b = b

    def __call__(self, y):
        # Only used on the (unfused) opaque-fn fallback path.
        return y @ self.w + self.b


class PreNorm:
    """JAX/Pallas port of `PreNorm(dim, fn)`: fn(LayerNorm(dim)(x), **kwargs).

    If `fn` is a PallasLinear (and no kwargs), LayerNorm and the Linear are
    fused into a single pallas_call.  Otherwise the opaque `fn` is applied to
    the output of the standalone LayerNorm kernel.
    """

    def __init__(self, dim, fn, layer=False):
        # nn.LayerNorm default init: weight=1, bias=0
        self.gamma = jnp.ones((dim,), jnp.float32)
        self.beta = jnp.zeros((dim,), jnp.float32)
        self.fn = fn

    def __call__(self, x, **kwargs):
        if isinstance(self.fn, PallasLinear) and not kwargs:
            return prenorm_linear_pallas(x, self.gamma, self.beta,
                                         self.fn.w, self.fn.b)
        # TODO(synk): opaque `fn` cannot be fused into the kernel; it runs as
        # ordinary JAX on the LayerNorm kernel's output.
        y = layernorm_pallas(x, self.gamma, self.beta)
        return self.fn(y, **kwargs)


if __name__ == "__main__":
    B, S, D = 2, 200, 128          # R = 400 rows -> padded to 512 (tile_rows=256, grid=2)
    key = jax.random.PRNGKey(0)
    kx, kw, kb = jax.random.split(key, 3)

    x = jax.random.normal(kx, (B, S, D), dtype=jnp.float32)

    # Deterministic Linear(D, D) as the wrapped `fn` (synthetic weights).
    w = jax.random.normal(kw, (D, D), dtype=jnp.float32) * (1.0 / jnp.sqrt(D))
    b = jax.random.normal(kb, (D,), dtype=jnp.float32) * 0.01

    prenorm = PreNorm(D, PallasLinear(w, b))
    out = jax.block_until_ready(prenorm(x))

    # Reference (plain JAX, same semantics as torch LayerNorm + Linear).
    mean = jnp.mean(x, axis=-1, keepdims=True)
    var = jnp.mean((x - mean) ** 2, axis=-1, keepdims=True)
    y_ref = (x - mean) * jax.lax.rsqrt(var + _LN_EPS) * prenorm.gamma + prenorm.beta
    out_ref = y_ref @ w + b
    assert out.shape == (B, S, D)
    assert jnp.allclose(out, out_ref, atol=2e-4, rtol=2e-4)

    # Also exercise the unfused path with an opaque fn (GELU).
    prenorm_gelu = PreNorm(D, lambda y: jax.nn.gelu(y))
    out2 = jax.block_until_ready(prenorm_gelu(x))
    out2_ref = jax.nn.gelu(y_ref)
    assert jnp.allclose(out2, out2_ref, atol=2e-4, rtol=2e-4)

    print("KERNEL_OK")
</pallas_src>

<mosaic_0001>
module attributes {stable_mosaic.version = 11 : i64} {
  func.func @_prenorm_linear_kernel(%arg0: i32, %arg1: memref<256x128xf32, #tpu.memory_space<vmem>>, %arg2: memref<1x128xf32, #tpu.memory_space<vmem>>, %arg3: memref<1x128xf32, #tpu.memory_space<vmem>>, %arg4: memref<128x128xf32, #tpu.memory_space<vmem>>, %arg5: memref<1x128xf32, #tpu.memory_space<vmem>>, %arg6: memref<256x128xf32, #tpu.memory_space<vmem>>) attributes {dimension_semantics = [#tpu.dimension_semantics<parallel>], iteration_bounds = array<i64: 2>, scalar_prefetch = 0 : i64, scratch_operands = 0 : i64, tpu.core_type = #tpu.core_type<tc>, window_params = [{transform_indices = @transform_0, window_bounds = array<i64: 256, 128>}, {pipeline_mode = #tpu.pipeline_mode<synchronous>, transform_indices = @transform_1, window_bounds = array<i64: 1, 128>}, {pipeline_mode = #tpu.pipeline_mode<synchronous>, transform_indices = @transform_2, window_bounds = array<i64: 1, 128>}, {pipeline_mode = #tpu.pipeline_mode<synchronous>, transform_indices = @transform_3, window_bounds = array<i64: 128, 128>}, {pipeline_mode = #tpu.pipeline_mode<synchronous>, transform_indices = @transform_4, window_bounds = array<i64: 1, 128>}, {transform_indices = @transform_5, window_bounds = array<i64: 256, 128>}]} {
    %c0 = arith.constant 0 : index
    %c0_0 = arith.constant 0 : index
    %0 = vector.load %arg1[%c0, %c0_0] : memref<256x128xf32, #tpu.memory_space<vmem>>, vector<256x128xf32>
    %cst = arith.constant dense<0.000000e+00> : vector<256xf32>
    %1 = vector.multi_reduction <add>, %0, %cst [1] : vector<256x128xf32> to vector<256xf32>
    %2 = vector.shape_cast %1 : vector<256xf32> to vector<256x1xf32>
    %cst_1 = arith.constant 1.280000e+02 : f32
    %3 = vector.broadcast %cst_1 : f32 to vector<256x1xf32>
    %4 = arith.divf %2, %3 : vector<256x1xf32>
    %5 = vector.broadcast %4 : vector<256x1xf32> to vector<256x128xf32>
    %6 = arith.subf %0, %5 : vector<256x128xf32>
    %7 = arith.mulf %6, %6 : vector<256x128xf32>
    %cst_2 = arith.constant dense<0.000000e+00> : vector<256xf32>
    %8 = vector.multi_reduction <add>, %7, %cst_2 [1] : vector<256x128xf32> to vector<256xf32>
    %9 = vector.shape_cast %8 : vector<256xf32> to vector<256x1xf32>
    %cst_3 = arith.constant 1.280000e+02 : f32
    %10 = vector.broadcast %cst_3 : f32 to vector<256x1xf32>
    %11 = arith.divf %9, %10 : vector<256x1xf32>
    %cst_4 = arith.constant 9.99999974E-6 : f32
    %12 = vector.broadcast %cst_4 : f32 to vector<256x1xf32>
    %13 = arith.addf %11, %12 : vector<256x1xf32>
    %14 = math.rsqrt %13 : vector<256x1xf32>
    %15 = vector.broadcast %14 : vector<256x1xf32> to vector<256x128xf32>
    %16 = arith.mulf %6, %15 : vector<256x128xf32>
    %c0_5 = arith.constant 0 : index
    %c0_6 = arith.constant 0 : index
    %17 = vector.load %arg2[%c0_5, %c0_6] : memref<1x128xf32, #tpu.memory_space<vmem>>, vector<1x128xf32>
    %18 = vector.broadcast %17 : vector<1x128xf32> to vector<256x128xf32>
    %19 = arith.mulf %16, %18 : vector<256x128xf32>
    %c0_7 = arith.constant 0 : index
    %c0_8 = arith.constant 0 : index
    %20 = vector.load %arg3[%c0_7, %c0_8] : memref<1x128xf32, #tpu.memory_space<vmem>>, vector<1x128xf32>
    %21 = vector.broadcast %20 : vector<1x128xf32> to vector<256x128xf32>
    %22 = arith.addf %19, %21 : vector<256x128xf32>
    %c0_9 = arith.constant 0 : index
    %c0_10 = arith.constant 0 : index
    %23 = vector.load %arg4[%c0_9, %c0_10] : memref<128x128xf32, #tpu.memory_space<vmem>>, vector<128x128xf32>
    %cst_11 = arith.constant dense<0.000000e+00> : vector<256x128xf32>
    %24 = tpu.matmul %22, %23, %cst_11 {dimension_numbers = #tpu.dot_dimension_numbers<[1], [0], [0], [1], [0, 0, 1, 1], [], []>} : vector<256x128xf32>, vector<128x128xf32>, vector<256x128xf32> -> vector<256x128xf32>
    %c0_12 = arith.constant 0 : index
    %c0_13 = arith.constant 0 : index
    %25 = vector.load %arg5[%c0_12, %c0_13] : memref<1x128xf32, #tpu.memory_space<vmem>>, vector<1x128xf32>
    %26 = vector.broadcast %25 : vector<1x128xf32> to vector<256x128xf32>
    %27 = arith.addf %24, %26 : vector<256x128xf32>
    %c0_14 = arith.constant 0 : index
    %c0_15 = arith.constant 0 : index
    %28 = vector.load %arg6[%c0_14, %c0_15] : memref<256x128xf32, #tpu.memory_space<vmem>>, vector<256x128xf32>
    tpu.vector_store %arg6[%c0_14, %c0_15], %27 {strides = array<i32>} : memref<256x128xf32, #tpu.memory_space<vmem>>, vector<256x128xf32>,
    return
  }
  func.func @transform_0(%arg0: i32) -> (i32, i32) {
    %c0_i32 = arith.constant 0 : i32
    %c0_i32_0 = arith.constant 0 : i32
    return %arg0, %c0_i32 : i32, i32
  }
  func.func @transform_1(%arg0: i32) -> (i32, i32) {
    %c0_i32 = arith.constant 0 : i32
    %c0_i32_0 = arith.constant 0 : i32
    %c0_i32_1 = arith.constant 0 : i32
    return %c0_i32, %c0_i32_0 : i32, i32
  }
  func.func @transform_2(%arg0: i32) -> (i32, i32) {
    %c0_i32 = arith.constant 0 : i32
    %c0_i32_0 = arith.constant 0 : i32
    %c0_i32_1 = arith.constant 0 : i32
    return %c0_i32, %c0_i32_0 : i32, i32
  }
  func.func @transform_3(%arg0: i32) -> (i32, i32) {
    %c0_i32 = arith.constant 0 : i32
    %c0_i32_0 = arith.constant 0 : i32
    %c0_i32_1 = arith.constant 0 : i32
    return %c0_i32, %c0_i32_0 : i32, i32
  }
  func.func @transform_4(%arg0: i32) -> (i32, i32) {
    %c0_i32 = arith.constant 0 : i32
    %c0_i32_0 = arith.constant 0 : i32
    %c0_i32_1 = arith.constant 0 : i32
    return %c0_i32, %c0_i32_0 : i32, i32
  }
  func.func @transform_5(%arg0: i32) -> (i32, i32) {
    %c0_i32 = arith.constant 0 : i32
    %c0_i32_0 = arith.constant 0 : i32
    return %arg0, %c0_i32 : i32, i32
  }
}

</mosaic_0001>

<bundles_post_ra>
// kernel: prenorm_linear_pallas.1
= control target key start
LH: loop header
LB: loop body
LE: loop exit
PB: predicated region body
PF: predicated region fallthrough
CT: control target
= control target key end

     0   :  { %s1327_s18 = smov 0   ;;  %s1866_s0 = inlined_call_operand.vmem [shape: f32[512,128], index: 0, kind: input, shape index: {}]   ;;  %s1867_s1 = inlined_call_operand.vmem [shape: f32[1,128], index: 1, kind: input, shape index: {}]   ;;  %s1868_s2 = inlined_call_operand.vmem [shape: f32[1,128], index: 2, kind: input, shape index: {}]   ;;  %s1869_s3 = inlined_call_operand.vmem [shape: f32[128,128], index: 3, kind: input, shape index: {}]   ;;  %s1870_s4 = inlined_call_operand.vmem [shape: f32[1,128], index: 4, kind: input, shape index: {}]   ;;  %s1871_s5 = inlined_call_operand.vmem [shape: f32[512,128], index: 5, kind: output, shape index: {}]  }
   0x1 LB: > { %s1027_s19 = sadd.s32 4294967295, %s1295_s18   ;;  %p1031_p0 = scmp.ge.s32.totalorder %s1295_s18, 1  ;;  %s1295_s18 = sphi %s1327_s18, %s15_s18  }
   0x2   : > { %p188_p1 = scmp.lt.s32.totalorder %s1295_s18, 3 }
   0x4   : > { %p189_p2 = pnand %p1031_p0, %p188_p1 }
   0x5   : > { %s1032_s20 = sshll.u32 (!%p189_p2), %s1027_s19, 5  ;;  %v691_v32 = vld [vmem:[%s1869_s3] sm:$0xff] (!%p189_p2)  ;;  %v692_v33 = vld [vmem:[%s1869_s3 + $0x8] sm:$0xff] (!%p189_p2)  ;;  %v693_v34 = vld [vmem:[%s1869_s3 + $0x10] sm:$0xff] (!%p189_p2) }
   0x6   : > { %192 = sbr.rel (%p189_p2) target bundleno = 608 (0x260), region = 40  ;;  %p217_p3 = scmp.lt.s32.totalorder (!%p189_p2), %s1032_s20, 63  ;;  %v1169_v35 = vpack.c.bf16 (!%p189_p2), %v692_v33, %v691_v32  ;;  %v694_v36 = vld [vmem:[%s1869_s3 + $0x18] sm:$0xff] (!%p189_p2) }
   0x7   : > { %v1173_v37 = vpack.c.bf16 (!%p189_p2), %v694_v36, %v693_v34  ;;  %v695_v36 = vld [vmem:[%s1869_s3 + $0x20] sm:$0xff] (!%p189_p2) }
   0x8   : > { %1170 = vmatprep.subr.bf16.mxu0 (!%p189_p2), %v1169_v35  ;;  %1201 = vmatprep.subr.bf16.mxu1 (!%p189_p2), %v1169_v35 }
   0x9   : > { %1172 = vmatpush3.bf16.msra.mxu0 (!%p189_p2), %v1169_v35  ;;  %1209 = vmatpush3.bf16.msra.mxu1 (!%p189_p2), %v1169_v35 }
   0xa   : > { %1174 = vmatprep.subr.bf16.mxu0 (!%p189_p2), %v1173_v37  ;;  %1202 = vmatprep.subr.bf16.mxu1 (!%p189_p2), %v1173_v37 }
   0xd   : > { %s1873_s20 = smov (!%p217_p3, %s1032_s20), 63  ;;  %1176 = vmatpush3.bf16.msra.mxu0 %v1173_v37  ;;  %1210 = vmatpush3.bf16.msra.mxu1 %v1173_v37  ;;  %v696_v37 = vld [vmem:[%s1869_s3 + $0x28] sm:$0xff] }
   0xe   : > { %s1033_s21 = sshll.u32 %s1873_s20, 3 }
   0xf   : > { %s1343_s24 = scalar_lea.vmem %s1866_s0, %s1033_s21  ;;  %s1797_s19 = scalar_lea.vmem %s1871_s5, %s1033_s21 }
  0x10   : > { %v1346_v0 = vld [vmem:[%s1343_s24] sm:$0xff]  ;;  %v1349_v1 = vld [vmem:[%s1343_s24 + $0x8] sm:$0xff]  ;;  %v1362_v4 = vld [vmem:[%s1343_s24 + $0x10] sm:$0xff] }
  0x11   : > { %260 = vadd.xlane.f32.xlu0 %v1346_v0  ;;  %262 = vadd.xlane.f32.xlu1 %v1349_v1  ;;  %v1354_v2 = vld [vmem:[%s1343_s24 + $0x80] sm:$0xff]  ;;  %v1357_v3 = vld [vmem:[%s1343_s24 + $0x88] sm:$0xff]  ;;  %v1365_v5 = vld [vmem:[%s1343_s24 + $0x90] sm:$0xff] }
  0x12   : > { %v1370_v6 = vld [vmem:[%s1343_s24 + $0x18] sm:$0xff]  ;;  %v1378_v8 = vld [vmem:[%s1343_s24 + $0x20] sm:$0xff]  ;;  %v1386_v10 = vld [vmem:[%s1343_s24 + $0x28] sm:$0xff] }
  0x13   : > { %v1373_v7 = vld [vmem:[%s1343_s24 + $0x98] sm:$0xff]  ;;  %v1381_v9 = vld [vmem:[%s1343_s24 + $0xa0] sm:$0xff]  ;;  %v1389_v11 = vld [vmem:[%s1343_s24 + $0xa8] sm:$0xff] }
  0x14   : > { %v1394_v12 = vld [vmem:[%s1343_s24 + $0x30] sm:$0xff]  ;;  %v1402_v14 = vld [vmem:[%s1343_s24 + $0x38] sm:$0xff]  ;;  %v1410_v16 = vld [vmem:[%s1343_s24 + $0x40] sm:$0xff] }
  0x15   : > { %292 = vadd.xlane.f32.xlu0 %v1354_v2  ;;  %294 = vadd.xlane.f32.xlu1 %v1357_v3  ;;  %v1397_v13 = vld [vmem:[%s1343_s24 + $0xb0] sm:$0xff]  ;;  %v1405_v15 = vld [vmem:[%s1343_s24 + $0xb8] sm:$0xff]  ;;  %v1413_v17 = vld [vmem:[%s1343_s24 + $0xc0] sm:$0xff] }
  0x16   : > { %v1418_v18 = vld [vmem:[%s1343_s24 + $0x48] sm:$0xff]  ;;  %v1426_v20 = vld [vmem:[%s1343_s24 + $0x50] sm:$0xff]  ;;  %v1434_v22 = vld [vmem:[%s1343_s24 + $0x58] sm:$0xff] }
  0x17   : > { %v1421_v19 = vld [vmem:[%s1343_s24 + $0xc8] sm:$0xff]  ;;  %v1429_v21 = vld [vmem:[%s1343_s24 + $0xd0] sm:$0xff]  ;;  %v1437_v23 = vld [vmem:[%s1343_s24 + $0xd8] sm:$0xff] }
  0x18   : > { %v1442_v24 = vld [vmem:[%s1343_s24 + $0x60] sm:$0xff]  ;;  %v1450_v26 = vld [vmem:[%s1343_s24 + $0x68] sm:$0xff]  ;;  %v1458_v28 = vld [vmem:[%s1343_s24 + $0x70] sm:$0xff] }
  0x19   : > { %264 = vadd.xlane.f32.xlu0 %v1362_v4  ;;  %296 = vadd.xlane.f32.xlu1 %v1365_v5  ;;  %v1445_v25 = vld [vmem:[%s1343_s24 + $0xe0] sm:$0xff]  ;;  %v1453_v27 = vld [vmem:[%s1343_s24 + $0xe8] sm:$0xff]  ;;  %v1461_v29 = vld [vmem:[%s1343_s24 + $0xf0] sm:$0xff] }
  0x1a   : > { %v1466_v30 = vld [vmem:[%s1343_s24 + $0x78] sm:$0xff] }
  0x1b   : > { %v1469_v31 = vld [vmem:[%s1343_s24 + $0xf8] sm:$0xff] }
  0x1d   : > { %266 = vadd.xlane.f32.xlu0 %v1370_v6  ;;  %298 = vadd.xlane.f32.xlu1 %v1373_v7 }
  0x21   : > { %268 = vadd.xlane.f32.xlu0 %v1378_v8  ;;  %300 = vadd.xlane.f32.xlu1 %v1381_v9 }
  0x25   : > { %270 = vadd.xlane.f32.xlu0 %v1386_v10  ;;  %302 = vadd.xlane.f32.xlu1 %v1389_v11 }
  0x29   : > { %272 = vadd.xlane.f32.xlu0 %v1394_v12  ;;  %304 = vadd.xlane.f32.xlu1 %v1397_v13 }
  0x2d   : > { %274 = vadd.xlane.f32.xlu0 %v1402_v14  ;;  %306 = vadd.xlane.f32.xlu1 %v1405_v15 }
  0x31   : > { %276 = vadd.xlane.f32.xlu0 %v1410_v16  ;;  %308 = vadd.xlane.f32.xlu1 %v1413_v17 }
  0x35   : > { %278 = vadd.xlane.f32.xlu0 %v1418_v18  ;;  %310 = vadd.xlane.f32.xlu1 %v1421_v19 }
  0x39   : > { %280 = vadd.xlane.f32.xlu0 %v1426_v20  ;;  %312 = vadd.xlane.f32.xlu1 %v1429_v21 }
  0x3d   : > { %282 = vadd.xlane.f32.xlu0 %v1434_v22  ;;  %314 = vadd.xlane.f32.xlu1 %v1437_v23 }
  0x41   : > { %284 = vadd.xlane.f32.xlu0 %v1442_v24  ;;  %316 = vadd.xlane.f32.xlu1 %v1445_v25 }
  0x45   : > { %286 = vadd.xlane.f32.xlu0 %v1450_v26  ;;  %318 = vadd.xlane.f32.xlu1 %v1453_v27 }
  0x49   : > { %288 = vadd.xlane.f32.xlu0 %v1458_v28  ;;  %320 = vadd.xlane.f32.xlu1 %v1461_v29 }
  0x4d   : > { %290 = vadd.xlane.f32.xlu0 %v1466_v30  ;;  %322 = vadd.xlane.f32.xlu1 %v1469_v31 }
  0x9e   : > { %v261_v38 = vpop.xlane.xlu0 %260  ;;  %v263_v39 = vpop.xlane.xlu1 %262 }
  0x9f   : > { %v325_v40 = vmul.f32 0.0078125, %v261_v38  ;;  %v326_v41 = vmul.f32 0.0078125, %v263_v39 }
  0xa1   : > { %v1486_v42 = vsub.f32 %v1346_v0, %v325_v40  ;;  %v1489_v43 = vsub.f32 %v1349_v1, %v326_v41 }
  0xa2   : > { %v293_v44 = vpop.xlane.xlu0 %292  ;;  %v295_v45 = vpop.xlane.xlu1 %294 }
  0xa3   : > { %v341_v46 = vmul.f32 0.0078125, %v293_v44  ;;  %v389_v47 = vmul.f32 %v1486_v42, %v1486_v42  ;;  %v342_v48 = vmul.f32 0.0078125, %v295_v45  ;;  %v390_v51 = vmul.f32 %v1489_v43, %v1489_v43 }
  0xa5   : > { %v1494_v49 = vsub.f32 %v1354_v2, %v341_v46  ;;  %421 = vadd.xlane.f32.xlu0 %v389_v47  ;;  %v1497_v50 = vsub.f32 %v1357_v3, %v342_v48 }
  0xa6   : > { %v265_v52 = vpop.xlane.xlu0 %264  ;;  %v297_v53 = vpop.xlane.xlu1 %296 }
  0xa7   : > { %v327_v54 = vmul.f32 0.0078125, %v265_v52  ;;  %v405_v55 = vmul.f32 %v1494_v49, %v1494_v49  ;;  %v343_v56 = vmul.f32 0.0078125, %v297_v53  ;;  %v406_v59 = vmul.f32 %v1497_v50, %v1497_v50 }
  0xa9   : > { %v1504_v57 = vsub.f32 %v1362_v4, %v327_v54  ;;  %423 = vadd.xlane.f32.xlu0 %v390_v51  ;;  %453 = vadd.xlane.f32.xlu1 %v405_v55  ;;  %v1507_v58 = vsub.f32 %v1365_v5, %v343_v56  ;;  %v697_v51 = vld [vmem:[%s1869_s3 + $0x30] sm:$0xff] }
  0xaa   : > { %v267_v60 = vpop.xlane.xlu0 %266  ;;  %v299_v61 = vpop.xlane.xlu1 %298 }
  0xab   : > { %v328_v62 = vmul.f32 0.0078125, %v267_v60  ;;  %v391_v63 = vmul.f32 %v1504_v57, %v1504_v57  ;;  %v344_v0 = vmul.f32 0.0078125, %v299_v61  ;;  %v407_v3 = vmul.f32 %v1507_v58, %v1507_v58 }
  0xad   : > { %v1514_v1 = vsub.f32 %v1370_v6, %v328_v62  ;;  %455 = vadd.xlane.f32.xlu1 %v406_v59  ;;  %425 = vadd.xlane.f32.xlu0 %v391_v63  ;;  %v1517_v2 = vsub.f32 %v1373_v7, %v344_v0  ;;  %v699_v62 = vld [vmem:[%s1869_s3 + $0x40] sm:$0xff] }
  0xae   : > { %v269_v4 = vpop.xlane.xlu0 %268  ;;  %v301_v5 = vpop.xlane.xlu1 %300 }
  0xaf   : > { %v329_v32 = vmul.f32 0.0078125, %v269_v4  ;;  %v392_v33 = vmul.f32 %v1514_v1, %v1514_v1  ;;  %v345_v34 = vmul.f32 0.0078125, %v301_v5  ;;  %v408_v7 = vmul.f32 %v1517_v2, %v1517_v2 }
  0xb1   : > { %v1524_v35 = vsub.f32 %v1378_v8, %v329_v32  ;;  %457 = vadd.xlane.f32.xlu1 %v407_v3  ;;  %427 = vadd.xlane.f32.xlu0 %v392_v33  ;;  %v1527_v6 = vsub.f32 %v1381_v9, %v345_v34  ;;  %v1177_v8 = vpack.c.bf16 %v696_v37, %v695_v36 }
  0xb2   : > { %v271_v38 = vpop.xlane.xlu0 %270  ;;  %v303_v39 = vpop.xlane.xlu1 %302 }
  0xb3   : > { %v330_v40 = vmul.f32 0.0078125, %v271_v38  ;;  %v393_v41 = vmul.f32 %v1524_v35, %v1524_v35  ;;  %v346_v9 = vmul.f32 0.0078125, %v303_v39  ;;  %1178 = vmatprep.subr.bf16.mxu0 %v1177_v8  ;;  %1203 = vmatprep.subr.bf16.mxu1 %v1177_v8  ;;  %v409_v46 = vmul.f32 %v1527_v6, %v1527_v6 }
  0xb4   : > { %1180 = vmatpush3.bf16.msra.mxu0 %v1177_v8  ;;  %1211 = vmatpush3.bf16.msra.mxu1 %v1177_v8 }
  0xb5   : > { %v1540_v44 = vsub.f32 %v1386_v10, %v330_v40  ;;  %459 = vadd.xlane.f32.xlu1 %v408_v7  ;;  %429 = vadd.xlane.f32.xlu0 %v393_v41  ;;  %v1543_v45 = vsub.f32 %v1389_v11, %v346_v9  ;;  %v698_v10 = vld [vmem:[%s1869_s3 + $0x38] sm:$0xff]  ;;  %v701_v7 = vld [vmem:[%s1869_s3 + $0x50] sm:$0xff] }
  0xb6   : > { %v273_v47 = vpop.xlane.xlu0 %272  ;;  %v305_v48 = vpop.xlane.xlu1 %304  ;;  %v1181_v54 = vpack.c.bf16 %v698_v10, %v697_v51 }
  0xb7   : > { %v331_v52 = vmul.f32 0.0078125, %v273_v47  ;;  %v394_v11 = vmul.f32 %v1540_v44, %v1540_v44  ;;  %v347_v53 = vmul.f32 0.0078125, %v305_v48  ;;  %v410_v59 = vmul.f32 %v1543_v45, %v1543_v45 }
  0xb8   : > { %1182 = vmatprep.subr.bf16.mxu0 %v1181_v54  ;;  %1204 = vmatprep.subr.bf16.mxu1 %v1181_v54 }
  0xb9   : > { %v1556_v55 = vsub.f32 %v1394_v12, %v331_v52  ;;  %461 = vadd.xlane.f32.xlu1 %v409_v46  ;;  %431 = vadd.xlane.f32.xlu0 %v394_v11  ;;  %v1559_v56 = vsub.f32 %v1397_v13, %v347_v53  ;;  %v700_v12 = vld [vmem:[%s1869_s3 + $0x48] sm:$0xff]  ;;  %v703_v46 = vld [vmem:[%s1869_s3 + $0x60] sm:$0xff] }
  0xba   : > { %v275_v60 = vpop.xlane.xlu0 %274  ;;  %v307_v61 = vpop.xlane.xlu1 %306  ;;  %1184 = vmatpush3.bf16.msra.mxu0 %v1181_v54  ;;  %1212 = vmatpush3.bf16.msra.mxu1 %v1181_v54  ;;  %v1185_v3 = vpack.c.bf16 %v700_v12, %v699_v62 }
  0xbb   : > { %v332_v63 = vmul.f32 0.0078125, %v275_v60  ;;  %v395_v13 = vmul.f32 %v1556_v55, %v1556_v55  ;;  %v348_v0 = vmul.f32 0.0078125, %v307_v61  ;;  %v411_v32 = vmul.f32 %v1559_v56, %v1559_v56 }
  0xbc   : > { %1186 = vmatprep.subr.bf16.mxu0 %v1185_v3  ;;  %1205 = vmatprep.subr.bf16.mxu1 %v1185_v3 }
  0xbd   : > { %v1572_v4 = vsub.f32 %v1402_v14, %v332_v63  ;;  %463 = vadd.xlane.f32.xlu1 %v410_v59  ;;  %433 = vadd.xlane.f32.xlu0 %v395_v13  ;;  %v1575_v5 = vsub.f32 %v1405_v15, %v348_v0  ;;  %v702_v14 = vld [vmem:[%s1869_s3 + $0x58] sm:$0xff]  ;;  %v705_v59 = vld [vmem:[%s1869_s3 + $0x70] sm:$0xff] }
  0xbe   : > { %v277_v33 = vpop.xlane.xlu0 %276  ;;  %v309_v34 = vpop.xlane.xlu1 %308  ;;  %1188 = vmatpush3.bf16.msra.mxu0 %v1185_v3  ;;  %1213 = vmatpush3.bf16.msra.mxu1 %v1185_v3  ;;  %v1189_v38 = vpack.c.bf16 %v702_v14, %v701_v7 }
  0xbf   : > { %v333_v36 = vmul.f32 0.0078125, %v277_v33  ;;  %v396_v15 = vmul.f32 %v1572_v4, %v1572_v4  ;;  %v349_v37 = vmul.f32 0.0078125, %v309_v34  ;;  %v412_v40 = vmul.f32 %v1575_v5, %v1575_v5 }
  0xc0   : > { %1190 = vmatprep.subr.bf16.mxu0 %v1189_v38  ;;  %1206 = vmatprep.subr.bf16.mxu1 %v1189_v38 }
  0xc1   : > { %v1588_v39 = vsub.f32 %v1410_v16, %v333_v36  ;;  %465 = vadd.xlane.f32.xlu1 %v411_v32  ;;  %435 = vadd.xlane.f32.xlu0 %v396_v15  ;;  %v1591_v8 = vsub.f32 %v1413_v17, %v349_v37  ;;  %v704_v16 = vld [vmem:[%s1869_s3 + $0x68] sm:$0xff] }
  0xc2   : > { %v279_v41 = vpop.xlane.xlu0 %278  ;;  %v311_v9 = vpop.xlane.xlu1 %310  ;;  %1192 = vmatpush3.bf16.msra.mxu0 %v1189_v38  ;;  %1214 = vmatpush3.bf16.msra.mxu1 %v1189_v38  ;;  %v1193_v51 = vpack.c.bf16 %v704_v16, %v703_v46 }
  0xc3   : > { %v334_v47 = vmul.f32 0.0078125, %v279_v41  ;;  %v397_v17 = vmul.f32 %v1588_v39, %v1588_v39  ;;  %v350_v48 = vmul.f32 0.0078125, %v311_v9  ;;  %v413_v11 = vmul.f32 %v1591_v8, %v1591_v8 }
  0xc4   : > { %1194 = vmatprep.subr.bf16.mxu0 %v1193_v51  ;;  %1207 = vmatprep.subr.bf16.mxu1 %v1193_v51 }
  0xc5   : > { %v1604_v10 = vsub.f32 %v1418_v18, %v334_v47  ;;  %467 = vadd.xlane.f32.xlu1 %v412_v40  ;;  %437 = vadd.xlane.f32.xlu0 %v397_v17  ;;  %v1607_v52 = vsub.f32 %v1421_v19, %v350_v48  ;;  %v706_v18 = vld [vmem:[%s1869_s3 + $0x78] sm:$0xff] }
  0xc6   : > { %v281_v53 = vpop.xlane.xlu0 %280  ;;  %v313_v54 = vpop.xlane.xlu1 %312  ;;  %1196 = vmatpush3.bf16.msra.mxu0 %v1193_v51  ;;  %1215 = vmatpush3.bf16.msra.mxu1 %v1193_v51  ;;  %v1197_v62 = vpack.c.bf16 %v706_v18, %v705_v59 }
  0xc7   : > { %v335_v60 = vmul.f32 0.0078125, %v281_v53  ;;  %v398_v19 = vmul.f32 %v1604_v10, %v1604_v10  ;;  %v351_v61 = vmul.f32 0.0078125, %v313_v54  ;;  %v414_v13 = vmul.f32 %v1607_v52, %v1607_v52 }
  0xc8   : > { %1198 = vmatprep.subr.bf16.mxu0 %v1197_v62  ;;  %1208 = vmatprep.subr.bf16.mxu1 %v1197_v62 }
  0xc9   : > { %v1620_v12 = vsub.f32 %v1426_v20, %v335_v60  ;;  %469 = vadd.xlane.f32.xlu1 %v413_v11  ;;  %439 = vadd.xlane.f32.xlu0 %v398_v19  ;;  %v1623_v63 = vsub.f32 %v1429_v21, %v351_v61 }
  0xca   : > { %v283_v0 = vpop.xlane.xlu0 %282  ;;  %v315_v3 = vpop.xlane.xlu1 %314  ;;  %1200 = vmatpush3.bf16.msra.mxu0 %v1197_v62  ;;  %1216 = vmatpush3.bf16.msra.mxu1 %v1197_v62 }
  0xcb   : > { %v336_v32 = vmul.f32 0.0078125, %v283_v0  ;;  %v399_v33 = vmul.f32 %v1620_v12, %v1620_v12  ;;  %v352_v34 = vmul.f32 0.0078125, %v315_v3  ;;  %v415_v7 = vmul.f32 %v1623_v63, %v1623_v63 }
  0xcd   : > { %v1630_v20 = vsub.f32 %v1434_v22, %v336_v32  ;;  %471 = vadd.xlane.f32.xlu1 %v414_v13  ;;  %441 = vadd.xlane.f32.xlu0 %v399_v33  ;;  %v1633_v21 = vsub.f32 %v1437_v23, %v352_v34 }
  0xce   : > { %v285_v14 = vpop.xlane.xlu0 %284  ;;  %v317_v36 = vpop.xlane.xlu1 %316 }
  0xcf   : > { %v337_v15 = vmul.f32 0.0078125, %v285_v14  ;;  %v400_v37 = vmul.f32 %v1630_v20, %v1630_v20  ;;  %v353_v38 = vmul.f32 0.0078125, %v317_v36  ;;  %v416_v23 = vmul.f32 %v1633_v21, %v1633_v21 }
  0xd1   : > { %v1640_v40 = vsub.f32 %v1442_v24, %v337_v15  ;;  %473 = vadd.xlane.f32.xlu1 %v415_v7  ;;  %443 = vadd.xlane.f32.xlu0 %v400_v37  ;;  %v1643_v22 = vsub.f32 %v1445_v25, %v353_v38 }
  0xd2   : > { %v287_v41 = vpop.xlane.xlu0 %286  ;;  %v319_v9 = vpop.xlane.xlu1 %318 }
  0xd3   : > { %v338_v46 = vmul.f32 0.0078125, %v287_v41  ;;  %v401_v16 = vmul.f32 %v1640_v40, %v1640_v40  ;;  %v354_v47 = vmul.f32 0.0078125, %v319_v9  ;;  %v417_v25 = vmul.f32 %v1643_v22, %v1643_v22 }
  0xd5   : > { %v1650_v17 = vsub.f32 %v1450_v26, %v338_v46  ;;  %475 = vadd.xlane.f32.xlu1 %v416_v23  ;;  %445 = vadd.xlane.f32.xlu0 %v401_v16  ;;  %v1653_v24 = vsub.f32 %v1453_v27, %v354_v47 }
  0xd6   : > { %v289_v48 = vpop.xlane.xlu0 %288  ;;  %v321_v51 = vpop.xlane.xlu1 %320 }
  0xd7   : > { %v339_v11 = vmul.f32 0.0078125, %v289_v48  ;;  %v402_v53 = vmul.f32 %v1650_v17, %v1650_v17  ;;  %v355_v54 = vmul.f32 0.0078125, %v321_v51  ;;  %v418_v27 = vmul.f32 %v1653_v24, %v1653_v24 }
  0xd9   : > { %v1660_v59 = vsub.f32 %v1458_v28, %v339_v11  ;;  %477 = vadd.xlane.f32.xlu1 %v417_v25  ;;  %447 = vadd.xlane.f32.xlu0 %v402_v53  ;;  %v1663_v26 = vsub.f32 %v1461_v29, %v355_v54  ;;  %v1684_v54 = vld [vmem:[%s1867_s1] ss:$0 sm:$0xff] }
  0xda   : > { %v291_v18 = vpop.xlane.xlu0 %290  ;;  %v323_v60 = vpop.xlane.xlu1 %322 }
  0xdb   : > { %v340_v19 = vmul.f32 0.0078125, %v291_v18  ;;  %v403_v61 = vmul.f32 %v1660_v59, %v1660_v59  ;;  %v356_v62 = vmul.f32 0.0078125, %v323_v60  ;;  %v419_v29 = vmul.f32 %v1663_v26, %v1663_v26 }
  0xdd   : > { %v1670_v13 = vsub.f32 %v1466_v30, %v340_v19  ;;  %479 = vadd.xlane.f32.xlu1 %v418_v27  ;;  %449 = vadd.xlane.f32.xlu0 %v403_v61  ;;  %v1673_v28 = vsub.f32 %v1469_v31, %v356_v62  ;;  %v1690_v62 = vld [vmem:[%s1868_s2] ss:$0 sm:$0xff] }
  0xdf   : > { %v404_v0 = vmul.f32 %v1670_v13, %v1670_v13  ;;  %v420_v3 = vmul.f32 %v1673_v28, %v1673_v28 }
  0xe1   : > { %481 = vadd.xlane.f32.xlu1 %v419_v29  ;;  %451 = vadd.xlane.f32.xlu0 %v404_v0 }
  0xe5   : > { %483 = vadd.xlane.f32.xlu1 %v420_v3 }
 0x132   : > { %v422_v32 = vpop.xlane.xlu0 %421 }
 0x133   : > { %v485_v30 = vmul.f32 0.0078125, %v422_v32 }
 0x135   : > { %v517_v33 = vadd.f32 1e-05, %v485_v30 }
 0x136   : > { %v454_v34 = vpop.xlane.xlu1 %453  ;;  %v424_v7 = vpop.xlane.xlu0 %423 }
 0x137   : > { %1225 = vrsqrt.f32 %v517_v33  ;;  %v501_v31 = vmul.f32 0.0078125, %v454_v34  ;;  %v486_v14 = vmul.f32 0.0078125, %v424_v7 }
 0x139   : > { %v533_v36 = vadd.f32 1e-05, %v501_v31  ;;  %v518_v15 = vadd.f32 1e-05, %v486_v14 }
 0x13a   : > { %v456_v37 = vpop.xlane.xlu1 %455  ;;  %v426_v38 = vpop.xlane.xlu0 %425 }
 0x13b   : > { %1227 = vrsqrt.f32 %v533_v36  ;;  %v502_v23 = vmul.f32 0.0078125, %v456_v37  ;;  %v487_v41 = vmul.f32 0.0078125, %v426_v38 }
 0x13c   : > { %1229 = vrsqrt.f32 %v518_v15 }
 0x13d   : > { %v534_v9 = vadd.f32 1e-05, %v502_v23  ;;  %v519_v46 = vadd.f32 1e-05, %v487_v41 }
 0x13e   : > { %v458_v16 = vpop.xlane.xlu1 %457  ;;  %v428_v47 = vpop.xlane.xlu0 %427 }
 0x13f   : > { %1231 = vrsqrt.f32 %v534_v9  ;;  %v503_v25 = vmul.f32 0.0078125, %v458_v16  ;;  %v488_v48 = vmul.f32 0.0078125, %v428_v47 }
 0x140   : > { %1233 = vrsqrt.f32 %v519_v46 }
 0x141   : > { %v1226_v51 = vpop.eup %1225  ;;  %v535_v11 = vadd.f32 1e-05, %v503_v25  ;;  %v520_v53 = vadd.f32 1e-05, %v488_v48 }
 0x142   : > { %v460_v27 = vpop.xlane.xlu1 %459  ;;  %v430_v18 = vpop.xlane.xlu0 %429  ;;  %v581_v60 = vmul.f32 %v1226_v51, %v1486_v42 }
 0x143   : > { %1235 = vrsqrt.f32 %v535_v11  ;;  %v504_v19 = vmul.f32 0.0078125, %v460_v27  ;;  %v489_v61 = vmul.f32 0.0078125, %v430_v18 }
 0x144   : > { %1237 = vrsqrt.f32 %v520_v53  ;;  %v620_v29 = vmul.f32 %v1684_v54, %v581_v60 }
 0x145   : > { %v1228_v0 = vpop.eup %1227  ;;  %v536_v3 = vadd.f32 1e-05, %v504_v19  ;;  %v521_v32 = vadd.f32 1e-05, %v489_v61 }
 0x146   : > { %v1230_v30 = vpop.eup %1229  ;;  %v462_v33 = vpop.xlane.xlu1 %461  ;;  %v659_v7 = vadd.f32 %v1690_v62, %v620_v29  ;;  %v597_v42 = vmul.f32 %v1228_v0, %v1494_v49 }
 0x147   : > { %v432_v34 = vpop.xlane.xlu0 %431  ;;  %1239 = vrsqrt.f32 %v536_v3  ;;  %v505_v31 = vmul.f32 0.0078125, %v462_v33  ;;  %v582_v36 = vmul.f32 %v1230_v30, %v1489_v43 }
 0x148   : > { %v490_v14 = vmul.f32 0.0078125, %v432_v34  ;;  %1241 = vrsqrt.f32 %v521_v32  ;;  %1121 = vmatprep.mubr.f32.mxu0 %v659_v7  ;;  %v636_v15 = vmul.f32 %v1684_v54, %v597_v42 }
 0x149   : > { %v1232_v37 = vpop.eup %1231  ;;  %v537_v38 = vadd.f32 1e-05, %v505_v31  ;;  %v621_v41 = vmul.f32 %v1684_v54, %v582_v36 }
 0x14a   : > { %v522_v23 = vadd.f32 1e-05, %v490_v14  ;;  %v1234_v9 = vpop.eup %1233  ;;  %v464_v46 = vpop.xlane.xlu1 %463  ;;  %v675_v47 = vadd.f32 %v1690_v62, %v636_v15  ;;  %v598_v49 = vmul.f32 %v1232_v37, %v1497_v50 }
 0x14b   : > { %v434_v16 = vpop.xlane.xlu0 %433  ;;  %1243 = vrsqrt.f32 %v537_v38  ;;  %v506_v25 = vmul.f32 0.0078125, %v464_v46  ;;  %v660_v43 = vadd.f32 %v1690_v62, %v621_v41  ;;  %v583_v51 = vmul.f32 %v1234_v9, %v1504_v57 }
 0x14c   : > { %v491_v48 = vmul.f32 0.0078125, %v434_v16  ;;  %1245 = vrsqrt.f32 %v522_v23  ;;  %1145 = vmatprep.mubr.f32.mxu1 %v675_v47  ;;  %v637_v11 = vmul.f32 %v1684_v54, %v598_v49 }
 0x14d   : > { %v1236_v53 = vpop.eup %1235  ;;  %v538_v27 = vadd.f32 1e-05, %v506_v25  ;;  %1122 = vmatmul.mubr.f32.vlgmr.msra.gmra.mrb[0].mxu0 %v660_v43  ;;  %v622_v50 = vmul.f32 %v1684_v54, %v583_v51 }
 0x14e   : > { %v523_v18 = vadd.f32 1e-05, %v491_v48  ;;  %v1238_v60 = vpop.eup %1237  ;;  %v466_v19 = vpop.xlane.xlu1 %465  ;;  %v676_v29 = vadd.f32 %v1690_v62, %v637_v11  ;;  %v599_v0 = vmul.f32 %v1236_v53, %v1507_v58 }
 0x14f   : > { %v436_v61 = vpop.xlane.xlu0 %435  ;;  %1247 = vrsqrt.f32 %v538_v27  ;;  %v507_v3 = vmul.f32 0.0078125, %v466_v19  ;;  %v584_v57 = vmul.f32 %v1238_v60, %v1514_v1  ;;  %v661_v30 = vadd.f32 %v1690_v62, %v622_v50 }
 0x150   : > { %v492_v32 = vmul.f32 0.0078125, %v436_v61  ;;  %1249 = vrsqrt.f32 %v523_v18  ;;  %1146 = vmatmul.mubr.f32.vlgmr.msra.gmra.mrb[0].mxu1 %v676_v29  ;;  %v638_v33 = vmul.f32 %v1684_v54, %v599_v0 }
 0x151   : > { %v1240_v34 = vpop.eup %1239  ;;  %v539_v7 = vadd.f32 1e-05, %v507_v3  ;;  %v623_v31 = vmul.f32 %v1684_v54, %v584_v57  ;;  %1124 = vmatprep.mubr.f32.mxu0 %v661_v30 }
 0x152   : > { %v524_v42 = vadd.f32 1e-05, %v492_v32  ;;  %v1242_v14 = vpop.eup %1241  ;;  %v468_v36 = vpop.xlane.xlu1 %467  ;;  %v677_v15 = vadd.f32 %v1690_v62, %v638_v33  ;;  %v600_v37 = vmul.f32 %v1240_v34, %v1517_v2 }
 0x153   : > { %v438_v58 = vpop.xlane.xlu0 %437  ;;  %1251 = vrsqrt.f32 %v539_v7  ;;  %v508_v1 = vmul.f32 0.0078125, %v468_v36  ;;  %v662_v23 = vadd.f32 %v1690_v62, %v623_v31  ;;  %v585_v41 = vmul.f32 %v1242_v14, %v1524_v35 }
 0x154   : > { %v493_v38 = vmul.f32 0.0078125, %v438_v58  ;;  %1253 = vrsqrt.f32 %v524_v42  ;;  %1148 = vmatprep.mubr.f32.mxu1 %v677_v15  ;;  %v639_v9 = vmul.f32 %v1684_v54, %v600_v37 }
 0x155   : > { %v1244_v46 = vpop.eup %1243  ;;  %v540_v16 = vadd.f32 1e-05, %v508_v1  ;;  %1125 = vmatmul.mubr.f32.gmra.mrb[2].mxu0 %v662_v23  ;;  %v624_v2 = vmul.f32 %v1684_v54, %v585_v41 }
 0x156   : > { %v525_v47 = vadd.f32 1e-05, %v493_v38  ;;  %v1246_v49 = vpop.eup %1245  ;;  %v470_v25 = vpop.xlane.xlu1 %469  ;;  %v678_v43 = vadd.f32 %v1690_v62, %v639_v9  ;;  %v601_v51 = vmul.f32 %v1244_v46, %v1527_v6 }
 0x157   : > { %v440_v48 = vpop.xlane.xlu0 %439  ;;  %1255 = vrsqrt.f32 %v540_v16  ;;  %v509_v11 = vmul.f32 0.0078125, %v470_v25  ;;  %v586_v35 = vmul.f32 %v1246_v49, %v1540_v44  ;;  %v663_v27 = vadd.f32 %v1690_v62, %v624_v2 }
 0x158   : > { %v494_v53 = vmul.f32 0.0078125, %v440_v48  ;;  %1257 = vrsqrt.f32 %v525_v47  ;;  %1149 = vmatmul.mubr.f32.gmra.mrb[2].mxu1 %v678_v43  ;;  %v640_v18 = vmul.f32 %v1684_v54, %v601_v51 }
 0x159   : > { %v1248_v60 = vpop.eup %1247  ;;  %v541_v19 = vadd.f32 1e-05, %v509_v11  ;;  %v625_v50 = vmul.f32 %v1684_v54, %v586_v35  ;;  %1127 = vmatprep.mubr.f32.mxu0 %v663_v27 }
 0x15a   : > { %v526_v61 = vadd.f32 1e-05, %v494_v53  ;;  %v1250_v29 = vpop.eup %1249  ;;  %v472_v0 = vpop.xlane.xlu1 %471  ;;  %v679_v3 = vadd.f32 %v1690_v62, %v640_v18  ;;  %v602_v32 = vmul.f32 %v1248_v60, %v1543_v45 }
 0x15b   : > { %v442_v6 = vpop.xlane.xlu0 %441  ;;  %1259 = vrsqrt.f32 %v541_v19  ;;  %v510_v44 = vmul.f32 0.0078125, %v472_v0  ;;  %v664_v30 = vadd.f32 %v1690_v62, %v625_v50  ;;  %v587_v33 = vmul.f32 %v1250_v29, %v1556_v55 }
 0x15c   : > { %v495_v57 = vmul.f32 0.0078125, %v442_v6  ;;  %1261 = vrsqrt.f32 %v526_v61  ;;  %1151 = vmatprep.mubr.f32.mxu1 %v679_v3  ;;  %v641_v34 = vmul.f32 %v1684_v54, %v602_v32 }
 0x15d   : > { %v1252_v7 = vpop.eup %1251  ;;  %v542_v42 = vadd.f32 1e-05, %v510_v44  ;;  %1128 = vmatmul.mubr.f32.gmra.mrb[4].mxu0 %v664_v30  ;;  %v626_v45 = vmul.f32 %v1684_v54, %v587_v33 }
 0x15e   : > { %v527_v31 = vadd.f32 1e-05, %v495_v57  ;;  %v1254_v14 = vpop.eup %1253  ;;  %v474_v36 = vpop.xlane.xlu1 %473  ;;  %v680_v15 = vadd.f32 %v1690_v62, %v641_v34  ;;  %v603_v37 = vmul.f32 %v1252_v7, %v1559_v56 }
 0x15f   : > { %v444_v58 = vpop.xlane.xlu0 %443  ;;  %1263 = vrsqrt.f32 %v542_v42  ;;  %v511_v1 = vmul.f32 0.0078125, %v474_v36  ;;  %v588_v55 = vmul.f32 %v1254_v14, %v1572_v4  ;;  %v665_v23 = vadd.f32 %v1690_v62, %v626_v45 }
 0x160   : > { %v496_v38 = vmul.f32 0.0078125, %v444_v58  ;;  %1265 = vrsqrt.f32 %v527_v31  ;;  %1152 = vmatmul.mubr.f32.gmra.mrb[4].mxu1 %v680_v15  ;;  %v642_v41 = vmul.f32 %v1684_v54, %v603_v37 }
 0x161   : > { %v1256_v9 = vpop.eup %1255  ;;  %v543_v46 = vadd.f32 1e-05, %v511_v1  ;;  %v627_v47 = vmul.f32 %v1684_v54, %v588_v55  ;;  %1130 = vmatprep.mubr.f32.mxu0 %v665_v23 }
 0x162   : > { %v528_v16 = vadd.f32 1e-05, %v496_v38  ;;  %v1258_v49 = vpop.eup %1257  ;;  %v476_v25 = vpop.xlane.xlu1 %475  ;;  %v681_v48 = vadd.f32 %v1690_v62, %v642_v41  ;;  %v604_v2 = vmul.f32 %v1256_v9, %v1575_v5 }
 0x163   : > { %v446_v56 = vpop.xlane.xlu0 %445  ;;  %1267 = vrsqrt.f32 %v543_v46  ;;  %v512_v4 = vmul.f32 0.0078125, %v476_v25  ;;  %v666_v51 = vadd.f32 %v1690_v62, %v627_v47  ;;  %v589_v11 = vmul.f32 %v1258_v49, %v1588_v39 }
 0x164   : > { %v497_v43 = vmul.f32 0.0078125, %v446_v56  ;;  %1269 = vrsqrt.f32 %v528_v16  ;;  %1154 = vmatprep.mubr.f32.mxu1 %v681_v48  ;;  %v643_v53 = vmul.f32 %v1684_v54, %v604_v2 }
 0x165   : > { %v1260_v35 = vpop.eup %1259  ;;  %v544_v27 = vadd.f32 1e-05, %v512_v4  ;;  %1131 = vmatmul.mubr.f32.gmra.mrb[6].mxu0 %v666_v51  ;;  %v628_v5 = vmul.f32 %v1684_v54, %v589_v11 }
 0x166   : > { %v529_v18 = vadd.f32 1e-05, %v497_v43  ;;  %v1262_v60 = vpop.eup %1261  ;;  %v478_v19 = vpop.xlane.xlu1 %477  ;;  %v682_v50 = vadd.f32 %v1690_v62, %v643_v53  ;;  %v605_v29 = vmul.f32 %v1260_v35, %v1591_v8 }
 0x167   : > { %v448_v61 = vpop.xlane.xlu0 %447  ;;  %1271 = vrsqrt.f32 %v544_v27  ;;  %v513_v0 = vmul.f32 0.0078125, %v478_v19  ;;  %v590_v39 = vmul.f32 %v1262_v60, %v1604_v10  ;;  %v667_v3 = vadd.f32 %v1690_v62, %v628_v5 }
 0x168   : > { %v498_v6 = vmul.f32 0.0078125, %v448_v61  ;;  %1273 = vrsqrt.f32 %v529_v18  ;;  %1155 = vmatmul.mubr.f32.gmra.mrb[6].mxu1 %v682_v50  ;;  %v644_v32 = vmul.f32 %v1684_v54, %v605_v29 }
 0x169   : > { %v1264_v44 = vpop.eup %1263  ;;  %v545_v57 = vadd.f32 1e-05, %v513_v0  ;;  %v629_v33 = vmul.f32 %v1684_v54, %v590_v39  ;;  %1133 = vmatprep.mubr.f32.mxu0 %v667_v3 }
 0x16a   : > { %v530_v30 = vadd.f32 1e-05, %v498_v6  ;;  %v1266_v34 = vpop.eup %1265  ;;  %v480_v7 = vpop.xlane.xlu1 %479  ;;  %v683_v42 = vadd.f32 %v1690_v62, %v644_v32  ;;  %v606_v31 = vmul.f32 %v1264_v44, %v1607_v52 }
 0x16b   : > { %v450_v8 = vpop.xlane.xlu0 %449  ;;  %1275 = vrsqrt.f32 %v545_v57  ;;  %v514_v10 = vmul.f32 0.0078125, %v480_v7  ;;  %v668_v36 = vadd.f32 %v1690_v62, %v629_v33  ;;  %v591_v58 = vmul.f32 %v1266_v34, %v1620_v12 }
 0x16c   : > { %v499_v14 = vmul.f32 0.0078125, %v450_v8  ;;  %1277 = vrsqrt.f32 %v530_v30  ;;  %1157 = vmatprep.mubr.f32.mxu1 %v683_v42  ;;  %v645_v45 = vmul.f32 %v1684_v54, %v606_v31 }
 0x16d   : > { %v1268_v15 = vpop.eup %1267  ;;  %v546_v37 = vadd.f32 1e-05, %v514_v10  ;;  %1134 = vmatmul.mubr.f32.gmra.mrb[8].mxu0 %v668_v36  ;;  %v630_v52 = vmul.f32 %v1684_v54, %v591_v58 }
 0x16e   : > { %v531_v1 = vadd.f32 1e-05, %v499_v14  ;;  %v1270_v38 = vpop.eup %1269  ;;  %v482_v55 = vpop.xlane.xlu1 %481  ;;  %v684_v41 = vadd.f32 %v1690_v62, %v645_v45  ;;  %v607_v9 = vmul.f32 %v1268_v15, %v1623_v63 }
 0x16f   : > { %v452_v23 = vpop.xlane.xlu0 %451  ;;  %1279 = vrsqrt.f32 %v546_v37  ;;  %v515_v46 = vmul.f32 0.0078125, %v482_v55  ;;  %v592_v12 = vmul.f32 %v1270_v38, %v1630_v20  ;;  %v669_v47 = vadd.f32 %v1690_v62, %v630_v52 }
 0x170   : > { %v500_v16 = vmul.f32 0.0078125, %v452_v23  ;;  %1281 = vrsqrt.f32 %v531_v1  ;;  %1158 = vmatmul.mubr.f32.gmra.mrb[8].mxu1 %v684_v41  ;;  %v646_v49 = vmul.f32 %v1684_v54, %v607_v9 }
 0x171   : > { %v1272_v25 = vpop.eup %1271  ;;  %v547_v56 = vadd.f32 1e-05, %v515_v46  ;;  %v631_v2 = vmul.f32 %v1684_v54, %v592_v12  ;;  %1136 = vmatprep.mubr.f32.mxu0 %v669_v47 }
 0x172   : > { %v532_v48 = vadd.f32 1e-05, %v500_v16  ;;  %v1274_v4 = vpop.eup %1273  ;;  %v484_v43 = vpop.xlane.xlu1 %483  ;;  %v685_v63 = vadd.f32 %v1690_v62, %v646_v49  ;;  %v608_v51 = vmul.f32 %v1272_v25, %v1633_v21 }
 0x173   : > { %1283 = vrsqrt.f32 %v547_v56  ;;  %v516_v20 = vmul.f32 0.0078125, %v484_v43  ;;  %v670_v11 = vadd.f32 %v1690_v62, %v631_v2  ;;  %v593_v53 = vmul.f32 %v1274_v4, %v1640_v40 }
 0x174   : > { %1285 = vrsqrt.f32 %v532_v48  ;;  %1160 = vmatprep.mubr.f32.mxu1 %v685_v63  ;;  %v647_v35 = vmul.f32 %v1684_v54, %v608_v51 }
 0x175   : > { %v1276_v27 = vpop.eup %1275  ;;  %v548_v18 = vadd.f32 1e-05, %v516_v20  ;;  %1137 = vmatmul.mubr.f32.gmra.mrb[10].mxu0 %v670_v11  ;;  %v632_v60 = vmul.f32 %v1684_v54, %v593_v53 }
 0x176   : > { %v1278_v19 = vpop.eup %1277  ;;  %v686_v61 = vadd.f32 %v1690_v62, %v647_v35  ;;  %v609_v21 = vmul.f32 %v1276_v27, %v1643_v22 }
 0x177   : > { %1287 = vrsqrt.f32 %v548_v18  ;;  %v671_v5 = vadd.f32 %v1690_v62, %v632_v60  ;;  %v594_v50 = vmul.f32 %v1278_v19, %v1650_v17 }
 0x178   : > { %1161 = vmatmul.mubr.f32.gmra.mrb[10].mxu1 %v686_v61  ;;  %v648_v40 = vmul.f32 %v1684_v54, %v609_v21 }
 0x179   : > { %v1280_v29 = vpop.eup %1279  ;;  %1139 = vmatprep.mubr.f32.mxu0 %v671_v5  ;;  %v633_v0 = vmul.f32 %v1684_v54, %v594_v50 }
 0x17a   : > { %v1282_v6 = vpop.eup %1281  ;;  %v687_v39 = vadd.f32 %v1690_v62, %v648_v40  ;;  %v610_v3 = vmul.f32 %v1280_v29, %v1653_v24 }
 0x17b   : > { %v672_v32 = vadd.f32 %v1690_v62, %v633_v0  ;;  %v595_v22 = vmul.f32 %v1282_v6, %v1660_v59 }
 0x17c   : > { %1163 = vmatprep.mubr.f32.mxu1 %v687_v39  ;;  %v649_v44 = vmul.f32 %v1684_v54, %v610_v3 }
 0x17d   : > { %v1284_v17 = vpop.eup %1283  ;;  %1140 = vmatmul.mubr.f32.gmra.mrb[12].mxu0 %v672_v32  ;;  %v634_v57 = vmul.f32 %v1684_v54, %v595_v22 }
 0x17e   : > { %v1286_v30 = vpop.eup %1285  ;;  %v688_v33 = vadd.f32 %v1690_v62, %v649_v44  ;;  %v611_v34 = vmul.f32 %v1284_v17, %v1663_v26 }
 0x17f   : > { %v673_v7 = vadd.f32 %v1690_v62, %v634_v57  ;;  %v596_v24 = vmul.f32 %v1286_v30, %v1670_v13  ;;  %v1790_v13 = vld [vmem:[%s1870_s4] ss:$0 sm:$0xff] }
 0x180   : > { %1164 = vmatmul.mubr.f32.gmra.mrb[12].mxu1 %v688_v33  ;;  %v650_v59 = vmul.f32 %v1684_v54, %v611_v34 }
 0x181   : > { %v1288_v8 = vpop.eup %1287  ;;  %1142 = vmatprep.mubr.f32.mxu0 %v673_v7  ;;  %v635_v42 = vmul.f32 %v1684_v54, %v596_v24 }
 0x182   : > { %v689_v31 = vadd.f32 %v1690_v62, %v650_v59  ;;  %v612_v10 = vmul.f32 %v1288_v8, %v1673_v28 }
 0x183   : > { %v674_v14 = vadd.f32 %v1690_v62, %v635_v42 }
 0x184   : > { %1166 = vmatprep.mubr.f32.mxu1 %v689_v31  ;;  %v651_v26 = vmul.f32 %v1684_v54, %v612_v10 }
 0x185   : > { %1143 = vmatmul.mubr.f32.gmra.mrb[14].mxu0 %v674_v14 }
 0x186   : > { %v690_v36 = vadd.f32 %v1690_v62, %v651_v26 }
 0x188   : > { %1167 = vmatmul.mubr.f32.gmra.mrb[14].mxu1 %v690_v36 }
 0x220   : > { %v1123_v28 = vpop.f32.mrb[0].mxu0 }
 0x221   : > { %v786_v54 = vadd.f32 %v1123_v28, %v1790_v13  ;;  %v780_v62 = vpop.f32.mrb[1].mxu0 }
 0x222   : > { %v781_v58 = vadd.f32 %v1790_v13, %v780_v62 }
 0x223   : > { %940 = vst [vmem:[%s1797_s19 + $0x8] sm:$0xff] %v786_v54  ;;  %v1147_v45 = vpop.f32.mrb[0].mxu1 }
 0x224   : > { %939 = vst [vmem:[%s1797_s19] sm:$0xff] %v781_v58  ;;  %v866_v15 = vadd.f32 %v1147_v45, %v1790_v13  ;;  %v860_v37 = vpop.f32.mrb[1].mxu1 }
 0x225   : > { %v861_v1 = vadd.f32 %v1790_v13, %v860_v37 }
 0x226   : > { %956 = vst [vmem:[%s1797_s19 + $0x88] sm:$0xff] %v866_v15 }
 0x227   : > { %955 = vst [vmem:[%s1797_s19 + $0x80] sm:$0xff] %v861_v1 }
 0x228   : > { %v1126_v38 = vpop.f32.mrb[2].mxu0 }
 0x229   : > { %v796_v55 = vadd.f32 %v1126_v38, %v1790_v13  ;;  %v790_v23 = vpop.f32.mrb[3].mxu0 }
 0x22a   : > { %v791_v52 = vadd.f32 %v1790_v13, %v790_v23 }
 0x22b   : > { %942 = vst [vmem:[%s1797_s19 + $0x18] sm:$0xff] %v796_v55  ;;  %v1150_v41 = vpop.f32.mrb[2].mxu1 }
 0x22c   : > { %941 = vst [vmem:[%s1797_s19 + $0x10] sm:$0xff] %v791_v52  ;;  %v876_v9 = vadd.f32 %v1150_v41, %v1790_v13  ;;  %v870_v46 = vpop.f32.mrb[3].mxu1 }
 0x22d   : > { %v871_v16 = vadd.f32 %v1790_v13, %v870_v46 }
 0x22e   : > { %958 = vst [vmem:[%s1797_s19 + $0x98] sm:$0xff] %v876_v9 }
 0x22f   : > { %957 = vst [vmem:[%s1797_s19 + $0x90] sm:$0xff] %v871_v16 }
 0x230   : > { %v1129_v12 = vpop.f32.mrb[4].mxu0 }
 0x231   : > { %v806_v47 = vadd.f32 %v1129_v12, %v1790_v13  ;;  %v800_v49 = vpop.f32.mrb[5].mxu0 }
 0x232   : > { %v801_v25 = vadd.f32 %v1790_v13, %v800_v49 }
 0x233   : > { %944 = vst [vmem:[%s1797_s19 + $0x28] sm:$0xff] %v806_v47  ;;  %v1153_v56 = vpop.f32.mrb[4].mxu1 }
 0x234   : > { %943 = vst [vmem:[%s1797_s19 + $0x20] sm:$0xff] %v801_v25  ;;  %v886_v48 = vadd.f32 %v1153_v56, %v1790_v13  ;;  %v880_v2 = vpop.f32.mrb[5].mxu1 }
 0x235   : > { %v881_v4 = vadd.f32 %v1790_v13, %v880_v2 }
 0x236   : > { %960 = vst [vmem:[%s1797_s19 + $0xa8] sm:$0xff] %v886_v48 }
 0x237   : > { %959 = vst [vmem:[%s1797_s19 + $0xa0] sm:$0xff] %v881_v4 }
 0x238   : > { %v1132_v43 = vpop.f32.mrb[6].mxu0 }
 0x239   : > { %v816_v63 = vadd.f32 %v1132_v43, %v1790_v13  ;;  %v810_v51 = vpop.f32.mrb[7].mxu0 }
 0x23a   : > { %v811_v20 = vadd.f32 %v1790_v13, %v810_v51 }
 0x23b   : > { %946 = vst [vmem:[%s1797_s19 + $0x38] sm:$0xff] %v816_v63  ;;  %v1156_v11 = vpop.f32.mrb[6].mxu1 }
 0x23c   : > { %945 = vst [vmem:[%s1797_s19 + $0x30] sm:$0xff] %v811_v20  ;;  %v896_v53 = vadd.f32 %v1156_v11, %v1790_v13  ;;  %v890_v35 = vpop.f32.mrb[7].mxu1 }
 0x23d   : > { %v891_v27 = vadd.f32 %v1790_v13, %v890_v35 }
 0x23e   : > { %962 = vst [vmem:[%s1797_s19 + $0xb8] sm:$0xff] %v896_v53 }
 0x23f   : > { %961 = vst [vmem:[%s1797_s19 + $0xb0] sm:$0xff] %v891_v27 }
 0x240   : > { %v1135_v18 = vpop.f32.mrb[8].mxu0 }
 0x241   : > { %v826_v60 = vadd.f32 %v1135_v18, %v1790_v13  ;;  %v820_v19 = vpop.f32.mrb[9].mxu0 }
 0x242   : > { %v821_v61 = vadd.f32 %v1790_v13, %v820_v19 }
 0x243   : > { %948 = vst [vmem:[%s1797_s19 + $0x48] sm:$0xff] %v826_v60  ;;  %v1159_v21 = vpop.f32.mrb[8].mxu1 }
 0x244   : > { %947 = vst [vmem:[%s1797_s19 + $0x40] sm:$0xff] %v821_v61  ;;  %v906_v5 = vadd.f32 %v1159_v21, %v1790_v13  ;;  %v900_v50 = vpop.f32.mrb[9].mxu1 }
 0x245   : > { %v901_v40 = vadd.f32 %v1790_v13, %v900_v50 }
 0x246   : > { %964 = vst [vmem:[%s1797_s19 + $0xc8] sm:$0xff] %v906_v5 }
 0x247   : > { %963 = vst [vmem:[%s1797_s19 + $0xc0] sm:$0xff] %v901_v40 }
 0x248   : > { %v1138_v29 = vpop.f32.mrb[10].mxu0 }
 0x249   : > { %v836_v0 = vadd.f32 %v1138_v29, %v1790_v13  ;;  %v830_v6 = vpop.f32.mrb[11].mxu0 }
 0x24a   : > { %v831_v39 = vadd.f32 %v1790_v13, %v830_v6 }
 0x24b   : > { %950 = vst [vmem:[%s1797_s19 + $0x58] sm:$0xff] %v836_v0  ;;  %v1162_v3 = vpop.f32.mrb[10].mxu1 }
 0x24c   : > { %949 = vst [vmem:[%s1797_s19 + $0x50] sm:$0xff] %v831_v39  ;;  %v916_v32 = vadd.f32 %v1162_v3, %v1790_v13  ;;  %v910_v22 = vpop.f32.mrb[11].mxu1 }
 0x24d   : > { %v911_v44 = vadd.f32 %v1790_v13, %v910_v22 }
 0x24e   : > { %966 = vst [vmem:[%s1797_s19 + $0xd8] sm:$0xff] %v916_v32 }
 0x24f   : > { %965 = vst [vmem:[%s1797_s19 + $0xd0] sm:$0xff] %v911_v44 }
 0x250   : > { %v1141_v17 = vpop.f32.mrb[12].mxu0 }
 0x251   : > { %v846_v57 = vadd.f32 %v1141_v17, %v1790_v13  ;;  %v840_v30 = vpop.f32.mrb[13].mxu0 }
 0x252   : > { %v841_v33 = vadd.f32 %v1790_v13, %v840_v30 }
 0x253   : > { %952 = vst [vmem:[%s1797_s19 + $0x68] sm:$0xff] %v846_v57  ;;  %v1165_v34 = vpop.f32.mrb[12].mxu1 }
 0x254   : > { %951 = vst [vmem:[%s1797_s19 + $0x60] sm:$0xff] %v841_v33  ;;  %v926_v7 = vadd.f32 %v1165_v34, %v1790_v13  ;;  %v920_v24 = vpop.f32.mrb[13].mxu1 }
 0x255   : > { %v921_v59 = vadd.f32 %v1790_v13, %v920_v24 }
 0x256   : > { %968 = vst [vmem:[%s1797_s19 + $0xe8] sm:$0xff] %v926_v7 }
 0x257   : > { %967 = vst [vmem:[%s1797_s19 + $0xe0] sm:$0xff] %v921_v59 }
 0x258   : > { %v1144_v8 = vpop.f32.mrb[14].mxu0 }
 0x259   : > { %v856_v42 = vadd.f32 %v1144_v8, %v1790_v13  ;;  %v850_v31 = vpop.f32.mrb[15].mxu0 }
 0x25a   : > { %v851_v10 = vadd.f32 %v1790_v13, %v850_v31 }
 0x25b   : > { %954 = vst [vmem:[%s1797_s19 + $0x78] sm:$0xff] %v856_v42  ;;  %v1168_v14 = vpop.f32.mrb[14].mxu1 }
 0x25c   : > { %953 = vst [vmem:[%s1797_s19 + $0x70] sm:$0xff] %v851_v10  ;;  %v936_v26 = vadd.f32 %v1168_v14, %v1790_v13  ;;  %v930_v36 = vpop.f32.mrb[15].mxu1 }
 0x25d   : > { %v931_v28 = vadd.f32 %v1790_v13, %v930_v36 }
 0x25e   : > { %970 = vst [vmem:[%s1797_s19 + $0xf8] sm:$0xff] %v936_v26 }
 0x25f   : > { %969 = vst [vmem:[%s1797_s19 + $0xf0] sm:$0xff] %v931_v28 }
 0x260 PF: > { %s15_s18 = sadd.s32 1, %s1295_s18  }
 0x261   : > { %p12_p4 = scmp.ge.s32.totalorder %s15_s18, 4  }
 0x263   :  { %14 = sbr.rel (!%p12_p4) target bundleno = 1 (0x1), region = 70 }

</bundles_post_ra>
